<compile_context>
chip_gen: v5e
topology: v5e:2x2
jax: 0.10.0
libtpu: 0.0.40
codegen_flags: <defaults>
</compile_context>

<pallas_src>
import jax
import jax.numpy as jnp
from jax.experimental import pallas as pl
from jax.experimental.pallas import tpu as pltpu


def _round_up(x: int, m: int) -> int:
    return ((x + m - 1) // m) * m


def _decoder_kernel(z_ref, w_ref, b_ref, o_ref):
    # z_ref: (TB, D) bf16 | w_ref: (D, OUT) bf16 (VMEM-resident) | b_ref: (1, OUT) f32
    # MXU bf16 matmul with f32 accumulation; f32 VPU bias add + EUP sigmoid epilogue.
    acc = jnp.dot(z_ref[...], w_ref[...], preferred_element_type=jnp.float32)
    acc = acc + b_ref[...]                          # (TB, OUT) + (1, OUT) broadcast
    o_ref[...] = jax.nn.sigmoid(acc).astype(o_ref.dtype)


class VAE_Decoder:
    """JAX/Pallas port of the (abstract) torch VAE_Decoder with a minimal concrete head."""

    def __init__(self, latent_dim: int, out_dim: int = 128, dtype=jnp.float32):
        self._latent_dim = latent_dim
        self._out_dim = out_dim          # kept a multiple of 128 for lane-dense stores
        self._out_dtype = dtype
        # Deterministic parameter init (synthetic; no checkpoint load).
        kw, kb = jax.random.split(jax.random.PRNGKey(42))
        scale = 1.0 / (latent_dim ** 0.5)
        # Weights stored in bf16: halves HBM->VMEM bytes + native MXU rate.
        self.W = (jax.random.normal(kw, (latent_dim, out_dim), jnp.float32)
                  * scale).astype(jnp.bfloat16)
        # Bias stays f32: epilogue (bias + sigmoid) is done in f32 in-kernel.
        self.b = jax.random.normal(kb, (1, out_dim), jnp.float32) * 0.01

    def get_latent_dim(self) -> int:
        return self._latent_dim

    def forward(self, z: jnp.ndarray) -> jnp.ndarray:
        B, D = z.shape
        assert D == self._latent_dim
        OUT = self._out_dim

        # Batch tile: multiple of 16 (bf16 sublane packing), capped at 512 rows so
        # double-buffered z (TB*D*2B) + out (TB*OUT*4B) tiles stay well under the
        # default scoped VMEM limit (relevant on v7x: 64 MiB physical / 32 MiB scoped).
        TB = min(512, _round_up(B, 16))
        B_pad = _round_up(B, TB)

        zb = z.astype(jnp.bfloat16)
        if B_pad != B:
            zb = jnp.pad(zb, ((0, B_pad - B), (0, 0)))

        cost = pl.CostEstimate(
            flops=2 * B_pad * D * OUT,
            transcendentals=B_pad * OUT,
            bytes_accessed=(2 * B_pad * D          # z (bf16)
                            + 2 * D * OUT          # W (bf16)
                            + 4 * OUT              # b (f32)
                            + 4 * B_pad * OUT),    # out (f32)
        )

        out = pl.pallas_call(
            _decoder_kernel,
            out_shape=jax.ShapeDtypeStruct((B_pad, OUT), self._out_dtype),
            grid_spec=pltpu.PrefetchScalarGridSpec(
                num_scalar_prefetch=0,
                grid=(B_pad // TB,),
                in_specs=[
                    pl.BlockSpec((TB, D), lambda i: (i, 0)),     # z tiles stream in
                    pl.BlockSpec((D, OUT), lambda i: (0, 0)),    # W resident across grid
                    pl.BlockSpec((1, OUT), lambda i: (0, 0)),    # b resident across grid
                ],
                out_specs=pl.BlockSpec((TB, OUT), lambda i: (i, 0)),
            ),
            compiler_params=pltpu.CompilerParams(
                # Batch tiles are independent -> shard grid steps across both v7x TCs.
                dimension_semantics=("parallel",),
            ),
            cost_estimate=cost,
        )(zb, self.W, self.b)

        return out[:B] if B_pad != B else out

    # infer == forward for this deterministic head.
    def infer(self, z: jnp.ndarray) -> jnp.ndarray:
        return self.forward(z)


if __name__ == "__main__":
    latent_dim = 32
    batch = 8
    out_dim = 128

    dec = VAE_Decoder(latent_dim, out_dim=out_dim)
    z = jax.random.normal(jax.random.PRNGKey(0), (batch, latent_dim), jnp.float32)

    out = jax.block_until_ready(dec.forward(z))
    assert out.shape == (batch, out_dim)
    assert dec.get_latent_dim() == latent_dim

    # Reference with the same bf16 input quantization (f32 accumulation), tight tol.
    w_f32 = dec.W.astype(jnp.float32)
    z_q = z.astype(jnp.bfloat16).astype(jnp.float32)
    ref_q = jax.nn.sigmoid(z_q @ w_f32 + dec.b)
    assert jnp.allclose(out, ref_q, atol=1e-3, rtol=1e-3)

    # Coarser check against the pure-f32 reference (bf16 input quantization error).
    ref_f32 = jax.nn.sigmoid(z @ w_f32 + dec.b)
    assert jnp.allclose(out, ref_f32, atol=3e-2, rtol=3e-2)

    print("KERNEL_OK")
</pallas_src>

<mosaic_0001>
module attributes {stable_mosaic.version = 11 : i64} {
  func.func @_decoder_kernel(%arg0: i32, %arg1: memref<16x32xbf16, #tpu.memory_space<vmem>>, %arg2: memref<32x128xbf16, #tpu.memory_space<vmem>>, %arg3: memref<1x128xf32, #tpu.memory_space<vmem>>, %arg4: memref<16x128xf32, #tpu.memory_space<vmem>>) attributes {dimension_semantics = [#tpu.dimension_semantics<parallel>], iteration_bounds = array<i64: 1>, scalar_prefetch = 0 : i64, scratch_operands = 0 : i64, tpu.core_type = #tpu.core_type<tc>, window_params = [{transform_indices = @transform_0, window_bounds = array<i64: 16, 32>}, {pipeline_mode = #tpu.pipeline_mode<synchronous>, transform_indices = @transform_1, window_bounds = array<i64: 32, 128>}, {pipeline_mode = #tpu.pipeline_mode<synchronous>, transform_indices = @transform_2, window_bounds = array<i64: 1, 128>}, {transform_indices = @transform_3, window_bounds = array<i64: 16, 128>}]} {
    %c0 = arith.constant 0 : index
    %c0_0 = arith.constant 0 : index
    %0 = vector.load %arg1[%c0, %c0_0] : memref<16x32xbf16, #tpu.memory_space<vmem>>, vector<16x32xbf16>
    %c0_1 = arith.constant 0 : index
    %c0_2 = arith.constant 0 : index
    %1 = vector.load %arg2[%c0_1, %c0_2] : memref<32x128xbf16, #tpu.memory_space<vmem>>, vector<32x128xbf16>
    %cst = arith.constant dense<0.000000e+00> : vector<16x128xf32>
    %2 = tpu.matmul %0, %1, %cst {dimension_numbers = #tpu.dot_dimension_numbers<[1], [0], [0], [1], [0, 0, 1, 1], [], []>} : vector<16x32xbf16>, vector<32x128xbf16>, vector<16x128xf32> -> vector<16x128xf32>
    %c0_3 = arith.constant 0 : index
    %c0_4 = arith.constant 0 : index
    %3 = vector.load %arg3[%c0_3, %c0_4] : memref<1x128xf32, #tpu.memory_space<vmem>>, vector<1x128xf32>
    %4 = vector.broadcast %3 : vector<1x128xf32> to vector<16x128xf32>
    %5 = arith.addf %2, %4 : vector<16x128xf32>
    %6 = arith.negf %5 : vector<16x128xf32>
    %7 = math.exp %6 : vector<16x128xf32>
    %cst_5 = arith.constant 1.000000e+00 : f32
    %8 = vector.broadcast %cst_5 : f32 to vector<16x128xf32>
    %9 = arith.addf %8, %7 : vector<16x128xf32>
    %10 = arith.divf %8, %9 : vector<16x128xf32>
    %c0_6 = arith.constant 0 : index
    %c0_7 = arith.constant 0 : index
    %11 = vector.load %arg4[%c0_6, %c0_7] : memref<16x128xf32, #tpu.memory_space<vmem>>, vector<16x128xf32>
    tpu.vector_store %arg4[%c0_6, %c0_7], %10 {strides = array<i32>} : memref<16x128xf32, #tpu.memory_space<vmem>>, vector<16x128xf32>,
    return
  }
  func.func @transform_0(%arg0: i32) -> (i32, i32) {
    %c0_i32 = arith.constant 0 : i32
    %c0_i32_0 = arith.constant 0 : i32
    return %arg0, %c0_i32 : i32, i32
  }
  func.func @transform_1(%arg0: i32) -> (i32, i32) {
    %c0_i32 = arith.constant 0 : i32
    %c0_i32_0 = arith.constant 0 : i32
    %c0_i32_1 = arith.constant 0 : i32
    return %c0_i32, %c0_i32_0 : i32, i32
  }
  func.func @transform_2(%arg0: i32) -> (i32, i32) {
    %c0_i32 = arith.constant 0 : i32
    %c0_i32_0 = arith.constant 0 : i32
    %c0_i32_1 = arith.constant 0 : i32
    return %c0_i32, %c0_i32_0 : i32, i32
  }
  func.func @transform_3(%arg0: i32) -> (i32, i32) {
    %c0_i32 = arith.constant 0 : i32
    %c0_i32_0 = arith.constant 0 : i32
    return %arg0, %c0_i32 : i32, i32
  }
}

</mosaic_0001>

<bundles_post_ra>
// kernel: tpu_custom_call.1
= control target key start
LH: loop header
LB: loop body
LE: loop exit
PB: predicated region body
PF: predicated region fallthrough
CT: control target
= control target key end

     0   :  { %8 = vsyncpa [#allocation3], 0  ;;  %s304_s0 = inlined_call_operand.hbm [shape: bf16[16,32], index: 0, kind: input, shape index: {}]   ;;  %s305_s1 = inlined_call_operand.hbm [shape: bf16[32,128], index: 1, kind: input, shape index: {}]   ;;  %s306_s2 = inlined_call_operand.vmem [shape: f32[1,128], index: 2, kind: input, shape index: {}]   ;;  %s307_s3 = inlined_call_operand.hbm [shape: f32[16,128], index: 3, kind: output, shape index: {}]  }
   0x1   :  { %9 = vsyncpa [#allocation6], 0 }
   0x2   :  { %10 = vsyncpa [#allocation4], 0  ;;  %s15_s14 = sshll.u32 %s304_s0, 4  ;;  %s265_s15 = smov [#allocation2]   ;;  %s16_s14 = int_to_ptr.hbm [resolvable:$true] %s15_s14 }
   0x3   :  { %s17_s16 = sshll.u32 %s265_s15, 4  ;;  %s28_s19 = sshll.u32 %s305_s1, 4  ;;  %s18_s16 = int_to_ptr.vmem [resolvable:$true] %s17_s16  ;;  %s29_s19 = int_to_ptr.hbm [resolvable:$true] %s28_s19 }
   0x4   :  { %s266_s20 = smov 64   ;;  %s267_s21 = smov 4  }
   0x5   :  { %23 = dma.hbm_to_vmem [thread:$0]  %s16_s14, 128, %s18_s16, [#allocation3], %s266_s20, %s266_s20, %s267_s21  }
   0x6   :  { %s268_s22 = smov [#allocation5]  }
   0x7   :  { %s30_s23 = sshll.u32 %s268_s22, 4  ;;  %s31_s23 = int_to_ptr.vmem [resolvable:$true] %s30_s23 }
   0x8   :  { %36 = dma.hbm_to_vmem [thread:$0]  %s29_s19, 256, %s31_s23, [#allocation6], %s266_s20, %s266_s20, %s267_s21  }
   0x9   :  { %259 = dma.done.wait [#allocation3], 128  }
   0xa   :  { %260 = vsyncadd [#allocation3], 4294967168 }
   0xb   :  { %261 = dma.done.wait [#allocation6], 256  }
   0xc   :  { %262 = vsyncadd [#allocation6], 4294967040  ;;  %v170_v0 = vld [vmem:[#allocation5 + $0x8] sm:$0xff]  ;;  %v169_v1 = vld [vmem:[#allocation5] sm:$0xff]  ;;  %vm75_vm0 = vcmask 261120   ;;  %s139_s27 = sshll.u32 %s307_s3, 4  ;;  %s140_s27 = int_to_ptr.hbm [resolvable:$true] %s139_s27 }
   0xd   :  { %85 = vmatpush.bf16.msra.mxu0 %v170_v0  ;;  %v168_v2 = vld [vmem:[#allocation2] sm:$0xff]  ;;  %s270_s28 = smov 128   ;;  %s271_s29 = smov 8  }
   0xe   :  { %v178_v3 = vld [vmem:[%s306_s2] ss:$0 sm:$0xff]  ;;  %s269_s2 = smov [#allocation7]  }
   0xf   :  { %s137_s24 = sshll.u32 %s269_s2, 4  ;;  %s138_s24 = int_to_ptr.vmem [resolvable:$true] %s137_s24 }
  0x11   :  { %86 = vmatpush.bf16.msra.mxu0 %v169_v1 }
  0x14   :  { %165 = vmatmul.msk.bf16.vlgmr.msra.gmra.mxu0 %vm75_vm0, %v168_v2 }
  0x91   :  { %v88_v4 = vpop.f32.mrf.mxu0 }
  0x92   :  { %v89_v5 = vadd.f32 %v178_v3, %v88_v4 }
  0x94   :  { %v166_v6 = vmul.f32 -1.442695, %v89_v5 }
  0x96   :  { %179 = vpow2.f32 %v166_v6 }
  0x99   :  { %v90_v7 = vpop.f32.mrf.mxu0 }
  0x9a   :  { %v91_v8 = vadd.f32 %v178_v3, %v90_v7 }
  0x9c   :  { %v180_v9 = vpop.eup %179  ;;  %v167_v10 = vmul.f32 -1.442695, %v91_v8 }
  0x9d   :  { %v99_v11 = vadd.f32 1.0, %v180_v9 }
  0x9e   :  { %181 = vpow2.f32 %v167_v10 }
  0x9f   :  { %183 = vrcp.f32 %v99_v11  ;;  %v112_v17 = vand.u32 2147483648, %v99_v11  ;;  %v110_v19 = vand.u32 2147483647, %v99_v11  ;;  %vm106_vm2 = vweird.f32 %v99_v11 }
  0xa1   :  { %v113_v22 = vor.u32 1.1754944e-38, %v112_v17  ;;  %vm111_vm4 = vcmp.eq.f32.partialorder %v110_v19, 8.507059e+37 }
  0xa4   :  { %v182_v12 = vpop.eup %181 }
  0xa5   :  { %v184_v13 = vpop.eup %183  ;;  %v100_v14 = vadd.f32 1.0, %v182_v12 }
  0xa6   :  { %v102_v15 = vmul.f32 %v184_v13, %v99_v11  ;;  %vm107_vm1 = vweird.f32 %v184_v13 }
  0xa7   :  { %185 = vrcp.f32 %v100_v14  ;;  %vm108_vm3 = vmor %vm106_vm2, %vm107_vm1  ;;  %v127_v27 = vand.u32 2147483648, %v100_v14  ;;  %v125_v29 = vand.u32 2147483647, %v100_v14  ;;  %vm121_vm6 = vweird.f32 %v100_v14 }
  0xa8   :  { %v103_v16 = vsub.f32 1.0, %v102_v15 }
  0xa9   :  { %v128_v31 = vor.u32 1.1754944e-38, %v127_v27  ;;  %vm126_vm8 = vcmp.eq.f32.partialorder %v125_v29, 8.507059e+37 }
  0xaa   :  { %v104_v18 = vmul.f32 %v184_v13, %v103_v16 }
  0xac   :  { %v105_v20 = vadd.f32 %v184_v13, %v104_v18 }
  0xad   :  { %v186_v21 = vpop.eup %185 }
  0xae   :  { %v117_v23 = vmul.f32 %v186_v21, %v100_v14  ;;  %v109_v24 = vsel %vm108_vm3, %v184_v13, %v105_v20  ;;  %vm122_vm5 = vweird.f32 %v186_v21 }
  0xaf   :  { %v114_v25 = vsel %vm111_vm4, %v113_v22, %v109_v24  ;;  %vm123_vm7 = vmor %vm121_vm6, %vm122_vm5 }
  0xb0   :  { %v118_v26 = vsub.f32 1.0, %v117_v23  ;;  %131 = vst [vmem:[#allocation7] sm:$0xff] %v114_v25 }
  0xb2   :  { %v119_v28 = vmul.f32 %v186_v21, %v118_v26 }
  0xb4   :  { %v120_v30 = vadd.f32 %v186_v21, %v119_v28 }
  0xb6   :  { %v124_v32 = vsel %vm123_vm7, %v186_v21, %v120_v30 }
  0xb7   :  { %v129_v33 = vsel %vm126_vm8, %v128_v31, %v124_v32 }
  0xb8   :  { %132 = vst [vmem:[#allocation7 + $0x8] sm:$0xff] %v129_v33 }
  0xb9   :  { %145 = dma.vmem_to_hbm [thread:$0]  %s138_s24, 256, %s140_s27, [#allocation4], %s270_s28, %s270_s28, %s271_s29  }
  0xba   :  { %263 = dma.done.wait [#allocation4], 256  }
  0xbb   :  { %264 = vsyncadd [#allocation4], 4294967040 }
  0xbc   :  { %150 = vsyncpa [#allocation3], 1 }
  0xbd   :  { %151 = vsyncpa [#allocation6], 1 }
  0xbe   :  { %152 = vsyncpa [#allocation4], 1 }

</bundles_post_ra>
